<compile_context>
chip_gen: v7x
topology: tpu7x:2x2x1
jax: 0.10.0
libtpu: 0.0.40
codegen_flags: <defaults>
</compile_context>

<pallas_src>
import jax
import jax.numpy as jnp
from jax import lax
from jax.experimental import pallas as pl
from jax.experimental.pallas import tpu as pltpu


def _round_up(a, m):
    return (a + m - 1) // m * m


def _pwff_kernel(x_ref, w1_ref, b1_ref, w2_ref, b2_ref, o_ref):
    # x_ref:  (TM, Wd) packed rows (P original positions per 128-lane row)
    # w1_ref: (Wd, Wd) block-diagonal conv1 weight, (out, in) layout
    # b1_ref: (1, Wd)  conv1 bias tiled P times (f32)
    # w2_ref: (Wd, Wd) block-diagonal conv2 weight, (out, in) layout
    # b2_ref: (1, Wd)  conv2 bias tiled P times (f32)
    # o_ref:  (TM, Wd)
    dn = (((1,), (1,)), ((), ()))  # contract channel axis with the weights' "in" axis
    x = x_ref[...]
    h = lax.dot_general(x, w1_ref[...], dimension_numbers=dn,
                        preferred_element_type=jnp.float32)
    h = jnp.maximum(h + b1_ref[...], 0.0)  # bias + ReLU, f32 VPU
    # TODO(synk): dropout1/dropout2 are identity at inference; no stochastic masking.
    y = lax.dot_general(h.astype(w2_ref.dtype), w2_ref[...], dimension_numbers=dn,
                        preferred_element_type=jnp.float32)
    o_ref[...] = (y + b2_ref[...] + x.astype(jnp.float32)).astype(o_ref.dtype)


def prepare_pwff_weights(w1, b1, w2, b2, *, lane_width=128, stream_dtype=None):
    """Expand Conv1d(k=1) weights once per weight set (hoist out of the hot path).

    Returns (w1d, b1d, w2d, b2d, P, Hp):
      * P positions are packed per lane_width-wide row and the weights become a
        block-diagonal (P*Hp, P*Hp) matrix kept in (out, in) layout, so every
        vreg/DMA tile is fully lane-dense.
      * If H neither divides lane_width nor is a multiple of 128, channels are
        zero-padded to Hp = round_up(H, 128) (keeps stores unmasked).
      * lane_width=256 may be used on v6e/v7x (256-wide MXU) when 256 % H == 0.
    """
    if w1.ndim == 3:  # accept raw Conv1d weight (out_ch, in_ch, 1)
        w1 = w1[..., 0]
    if w2.ndim == 3:
        w2 = w2[..., 0]
    H = w1.shape[0]
    if lane_width % H == 0:
        P, Hp = lane_width // H, H
    elif H % 128 == 0:
        P, Hp = 1, H
    else:
        Hp = _round_up(H, 128)
        P = 1
        pad = Hp - H
        w1 = jnp.pad(w1, ((0, pad), (0, pad)))
        w2 = jnp.pad(w2, ((0, pad), (0, pad)))
        b1 = jnp.pad(b1, (0, pad))
        b2 = jnp.pad(b2, (0, pad))
    Wd = P * Hp
    if P > 1:
        eye = jnp.eye(P, dtype=w1.dtype)
        w1 = jnp.kron(eye, w1)
        w2 = jnp.kron(eye, w2)
    b1d = jnp.tile(b1.astype(jnp.float32), P).reshape(1, Wd)
    b2d = jnp.tile(b2.astype(jnp.float32), P).reshape(1, Wd)
    if stream_dtype is not None:
        w1 = w1.astype(stream_dtype)
        w2 = w2.astype(stream_dtype)
    return w1, b1d, w2, b2d, P, Hp


def pointwise_feedforward(x, w1=None, b1=None, w2=None, b2=None, *,
                          prepared=None, block_rows=2048, stream_dtype=None,
                          out_dtype=None, lane_width=128):
    """x: (B, L, H). w1, w2: (H, H) Conv1d weights in (out_ch, in_ch) layout; b1, b2: (H,).

    prepared: optional result of prepare_pwff_weights (hoists the weight expansion).
    stream_dtype: stream x / weights in a narrower dtype (e.g. jnp.bfloat16) —
      recommended default on v5e; accumulation stays f32, but the residual then uses
      the stream-dtype-rounded x.
    out_dtype: output dtype (default x.dtype); bf16 output cuts HBM store traffic.
    """
    B, L, H = x.shape
    if out_dtype is None:
        out_dtype = x.dtype
    R = B * L

    if prepared is None:
        prepared = prepare_pwff_weights(w1, b1, w2, b2,
                                        lane_width=lane_width,
                                        stream_dtype=stream_dtype)
    w1d, b1d, w2d, b2d, P, Hp = prepared
    Wd = P * Hp

    if stream_dtype is not None and x.dtype != jnp.dtype(stream_dtype):
        x = x.astype(stream_dtype)

    x2d = x.reshape(R, H)
    if Hp != H:  # rare fallback: H not 128-friendly -> pad channels to full lanes
        x2d = jnp.pad(x2d, ((0, 0), (0, Hp - H)))

    # Sublane multiple: 8 for 4-byte tiles, 16 for 2-byte tiles (full vregs,
    # unmasked packed stores when streaming / emitting bf16).
    itembytes = min(jnp.dtype(x2d.dtype).itemsize, jnp.dtype(out_dtype).itemsize)
    mult = 8 * max(1, 4 // itembytes)

    # Pack P positions per lane-dense row.  Only a ragged tail (< P rows) or a
    # sub-one-tile input is ever padded; when R % P == 0 the reshape is a free
    # bitcast (no extra HBM pass) and the last row-tile may run partially out of
    # bounds (rows are independent; OOB stores are masked).
    rows_needed = -(-R // P)
    rows_alloc = max(rows_needed, mult)  # at least one full (mult, Wd) block
    if rows_alloc * P != R:
        x2d = jnp.pad(x2d, ((0, rows_alloc * P - R), (0, 0)))
    x_pk = x2d.reshape(rows_alloc, Wd)

    # Row tile: large (amortize ~0.35 us per grid step) but capped near half the
    # rows so the 1-D "parallel" grid keeps >= 2 steps for v7x's two TensorCores.
    half = _round_up(-(-rows_alloc // 2), mult)
    tm = max(mult, min(_round_up(block_rows, mult), half))
    grid = (pl.cdiv(rows_alloc, tm),)

    out_pk = pl.pallas_call(
        _pwff_kernel,
        out_shape=jax.ShapeDtypeStruct((rows_alloc, Wd), out_dtype),
        grid_spec=pltpu.PrefetchScalarGridSpec(
            num_scalar_prefetch=0,
            grid=grid,
            in_specs=[
                pl.BlockSpec((tm, Wd), lambda i: (i, 0)),   # x rows: tiled, pipelined
                pl.BlockSpec((Wd, Wd), lambda i: (0, 0)),   # w1: VMEM-resident
                pl.BlockSpec((1, Wd), lambda i: (0, 0)),    # b1
                pl.BlockSpec((Wd, Wd), lambda i: (0, 0)),   # w2
                pl.BlockSpec((1, Wd), lambda i: (0, 0)),    # b2
            ],
            out_specs=pl.BlockSpec((tm, Wd), lambda i: (i, 0)),
        ),
        compiler_params=pltpu.CompilerParams(
            # Row tiles are fully independent -> parallel (v7x shards over 2 TCs).
            dimension_semantics=("parallel",),
        ),
    )(x_pk, w1d, b1d, w2d, b2d)

    out2d = out_pk.reshape(rows_alloc * P, Hp)
    if rows_alloc * P != R:
        out2d = out2d[:R]
    if Hp != H:
        out2d = out2d[:, :H]
    return out2d.reshape(B, L, H)


def _ref_forward(x, w1, b1, w2, b2):
    # Pure-JAX reference of the PyTorch forward (dropout = identity).  Explicit
    # multiply-and-sum (f32 VPU) so the check is independent of XLA's default
    # matmul precision on TPU.
    h = jnp.sum(x[..., None, :] * w1[None, None, :, :], axis=-1) + b1
    h = jnp.maximum(h, 0.0)
    y = jnp.sum(h[..., None, :] * w2[None, None, :, :], axis=-1) + b2
    return y + x


if __name__ == "__main__":
    key = jax.random.PRNGKey(0)

    def make_inputs(k, B, L, H):
        kx, k1, k2, k3, k4 = jax.random.split(k, 5)
        x = jax.random.normal(kx, (B, L, H), dtype=jnp.float32)
        bound = 1.0 / (H ** 0.5)
        w1 = jax.random.uniform(k1, (H, H), minval=-bound, maxval=bound, dtype=jnp.float32)
        b1 = jax.random.uniform(k2, (H,), minval=-bound, maxval=bound, dtype=jnp.float32)
        w2 = jax.random.uniform(k3, (H, H), minval=-bound, maxval=bound, dtype=jnp.float32)
        b2 = jax.random.uniform(k4, (H,), minval=-bound, maxval=bound, dtype=jnp.float32)
        return x, w1, b1, w2, b2

    # 1) Small f32 case (batch=2, seq=8, hidden=32); weight expansion hoisted once.
    x, w1, b1, w2, b2 = make_inputs(key, 2, 8, 32)
    ref = _ref_forward(x, w1, b1, w2, b2)
    prepared_f32 = prepare_pwff_weights(w1, b1, w2, b2)
    out = jax.block_until_ready(pointwise_feedforward(x, prepared=prepared_f32))
    assert out.shape == (2, 8, 32)
    # Tolerance leaves headroom for MXU pass-precision / accumulation-order effects.
    assert jnp.allclose(out, ref, atol=2e-2, rtol=2e-2), "f32 mismatch vs reference"

    # 2) bf16 streaming + bf16 output (min HBM traffic; f32 accumulation/residual math).
    out_bf = jax.block_until_ready(
        pointwise_feedforward(x, w1, b1, w2, b2,
                              stream_dtype=jnp.bfloat16, out_dtype=jnp.bfloat16))
    assert out_bf.dtype == jnp.bfloat16
    assert jnp.allclose(out_bf.astype(jnp.float32), ref, atol=6e-2, rtol=6e-2), \
        "bf16 mismatch vs reference"

    # 3) Multi-tile grid + ragged tail (R % P != 0 -> tiny pad; partial last block).
    x3 = jax.random.normal(jax.random.fold_in(key, 7), (2, 333, 32), dtype=jnp.float32)
    ref3 = _ref_forward(x3, w1, b1, w2, b2)
    out3 = jax.block_until_ready(
        pointwise_feedforward(x3, prepared=prepared_f32, block_rows=64))
    assert out3.shape == (2, 333, 32)
    assert jnp.allclose(out3, ref3, atol=2e-2, rtol=2e-2), "tiled mismatch vs reference"

    # 4) H not 128-friendly (H=48) -> channel-padding fallback (full-lane stores).
    x4, w14, b14, w24, b24 = make_inputs(jax.random.fold_in(key, 11), 2, 8, 48)
    ref4 = _ref_forward(x4, w14, b14, w24, b24)
    out4 = jax.block_until_ready(pointwise_feedforward(x4, w14, b14, w24, b24))
    assert out4.shape == (2, 8, 48)
    assert jnp.allclose(out4, ref4, atol=2e-2, rtol=2e-2), "chan-pad mismatch vs reference"

    print("KERNEL_OK")
</pallas_src>

<mosaic_0001>
module attributes {stable_mosaic.version = 11 : i64} {
  func.func @_pwff_kernel(%arg0: i32, %arg1: memref<8x128xf32, #tpu.memory_space<vmem>>, %arg2: memref<128x128xf32, #tpu.memory_space<vmem>>, %arg3: memref<1x128xf32, #tpu.memory_space<vmem>>, %arg4: memref<128x128xf32, #tpu.memory_space<vmem>>, %arg5: memref<1x128xf32, #tpu.memory_space<vmem>>, %arg6: memref<8x128xf32, #tpu.memory_space<vmem>>) attributes {dimension_semantics = [#tpu.dimension_semantics<parallel>], iteration_bounds = array<i64: 1>, scalar_prefetch = 0 : i64, scratch_operands = 0 : i64, tpu.core_type = #tpu.core_type<tc>, window_params = [{transform_indices = @transform_0, window_bounds = array<i64: 8, 128>}, {pipeline_mode = #tpu.pipeline_mode<synchronous>, transform_indices = @transform_1, window_bounds = array<i64: 128, 128>}, {pipeline_mode = #tpu.pipeline_mode<synchronous>, transform_indices = @transform_2, window_bounds = array<i64: 1, 128>}, {pipeline_mode = #tpu.pipeline_mode<synchronous>, transform_indices = @transform_3, window_bounds = array<i64: 128, 128>}, {pipeline_mode = #tpu.pipeline_mode<synchronous>, transform_indices = @transform_4, window_bounds = array<i64: 1, 128>}, {transform_indices = @transform_5, window_bounds = array<i64: 8, 128>}]} {
    %c0 = arith.constant 0 : index
    %c0_0 = arith.constant 0 : index
    %0 = vector.load %arg1[%c0, %c0_0] : memref<8x128xf32, #tpu.memory_space<vmem>>, vector<8x128xf32>
    %c0_1 = arith.constant 0 : index
    %c0_2 = arith.constant 0 : index
    %1 = vector.load %arg2[%c0_1, %c0_2] : memref<128x128xf32, #tpu.memory_space<vmem>>, vector<128x128xf32>
    %cst = arith.constant dense<0.000000e+00> : vector<8x128xf32>
    %2 = tpu.matmul %0, %1, %cst {dimension_numbers = #tpu.dot_dimension_numbers<[1], [1], [0], [0], [0, 0, 1, 0], [], []>} : vector<8x128xf32>, vector<128x128xf32>, vector<8x128xf32> -> vector<8x128xf32>
    %c0_3 = arith.constant 0 : index
    %c0_4 = arith.constant 0 : index
    %3 = vector.load %arg3[%c0_3, %c0_4] : memref<1x128xf32, #tpu.memory_space<vmem>>, vector<1x128xf32>
    %4 = vector.broadcast %3 : vector<1x128xf32> to vector<8x128xf32>
    %5 = arith.addf %2, %4 : vector<8x128xf32>
    %cst_5 = arith.constant 0.000000e+00 : f32
    %6 = vector.broadcast %cst_5 : f32 to vector<8x128xf32>
    %7 = arith.maximumf %5, %6 : vector<8x128xf32>
    %c0_6 = arith.constant 0 : index
    %c0_7 = arith.constant 0 : index
    %8 = vector.load %arg4[%c0_6, %c0_7] : memref<128x128xf32, #tpu.memory_space<vmem>>, vector<128x128xf32>
    %cst_8 = arith.constant dense<0.000000e+00> : vector<8x128xf32>
    %9 = tpu.matmul %7, %8, %cst_8 {dimension_numbers = #tpu.dot_dimension_numbers<[1], [1], [0], [0], [0, 0, 1, 0], [], []>} : vector<8x128xf32>, vector<128x128xf32>, vector<8x128xf32> -> vector<8x128xf32>
    %c0_9 = arith.constant 0 : index
    %c0_10 = arith.constant 0 : index
    %10 = vector.load %arg5[%c0_9, %c0_10] : memref<1x128xf32, #tpu.memory_space<vmem>>, vector<1x128xf32>
    %11 = vector.broadcast %10 : vector<1x128xf32> to vector<8x128xf32>
    %12 = arith.addf %9, %11 : vector<8x128xf32>
    %13 = arith.addf %12, %0 : vector<8x128xf32>
    %c0_11 = arith.constant 0 : index
    %c0_12 = arith.constant 0 : index
    %14 = vector.load %arg6[%c0_11, %c0_12] : memref<8x128xf32, #tpu.memory_space<vmem>>, vector<8x128xf32>
    tpu.vector_store %arg6[%c0_11, %c0_12], %13 {strides = array<i32>} : memref<8x128xf32, #tpu.memory_space<vmem>>, vector<8x128xf32>,
    return
  }
  func.func @transform_0(%arg0: i32) -> (i32, i32) {
    %c0_i32 = arith.constant 0 : i32
    %c0_i32_0 = arith.constant 0 : i32
    return %arg0, %c0_i32 : i32, i32
  }
  func.func @transform_1(%arg0: i32) -> (i32, i32) {
    %c0_i32 = arith.constant 0 : i32
    %c0_i32_0 = arith.constant 0 : i32
    %c0_i32_1 = arith.constant 0 : i32
    return %c0_i32, %c0_i32_0 : i32, i32
  }
  func.func @transform_2(%arg0: i32) -> (i32, i32) {
    %c0_i32 = arith.constant 0 : i32
    %c0_i32_0 = arith.constant 0 : i32
    %c0_i32_1 = arith.constant 0 : i32
    return %c0_i32, %c0_i32_0 : i32, i32
  }
  func.func @transform_3(%arg0: i32) -> (i32, i32) {
    %c0_i32 = arith.constant 0 : i32
    %c0_i32_0 = arith.constant 0 : i32
    %c0_i32_1 = arith.constant 0 : i32
    return %c0_i32, %c0_i32_0 : i32, i32
  }
  func.func @transform_4(%arg0: i32) -> (i32, i32) {
    %c0_i32 = arith.constant 0 : i32
    %c0_i32_0 = arith.constant 0 : i32
    %c0_i32_1 = arith.constant 0 : i32
    return %c0_i32, %c0_i32_0 : i32, i32
  }
  func.func @transform_5(%arg0: i32) -> (i32, i32) {
    %c0_i32 = arith.constant 0 : i32
    %c0_i32_0 = arith.constant 0 : i32
    return %arg0, %c0_i32 : i32, i32
  }
}

</mosaic_0001>

<bundles_post_ra>
// kernel: tpu_custom_call.1
= control target key start
LH: loop header
LB: loop body
LE: loop exit
PB: predicated region body
PF: predicated region fallthrough
CT: control target
= control target key end

     0   :  { %10 = vsyncpa [#allocation3], 0  ;;  %s638_s0 = inlined_call_operand.hbm [shape: f32[8,128], index: 0, kind: input, shape index: {}]   ;;  %s639_s1 = inlined_call_operand.hbm [shape: f32[128,128], index: 1, kind: input, shape index: {}]   ;;  %s640_s2 = inlined_call_operand.vmem [shape: f32[1,128], index: 2, kind: input, shape index: {}]   ;;  %s641_s3 = inlined_call_operand.hbm [shape: f32[128,128], index: 3, kind: input, shape index: {}]   ;;  %s642_s4 = inlined_call_operand.vmem [shape: f32[1,128], index: 4, kind: input, shape index: {}]   ;;  %s643_s5 = inlined_call_operand.hbm [shape: f32[8,128], index: 5, kind: output, shape index: {}]  }
   0x1   :  { %11 = vsyncpa [#allocation6], 0 }
   0x2   :  { %12 = vsyncpa [#allocation4], 0  ;;  %s523_s18 = smov [#allocation5]   ;;  %s429_s22 = scalar_lea.hbm %s639_s1, 2048 }
   0x3   :  { %s28_s19 = sshll.u32 %s523_s18, 4  ;;  %p430_p0 = scmp.ne.s32.totalorder %s639_s1, %s429_s22  ;;  %s29_s19 = int_to_ptr.vmem [resolvable:$true] %s28_s19 }
   0x4   :  { %p433_p1 = scmp.lt.u32.totalorder %s429_s22, %s639_s1 }
   0x6   :  { %p435_p2 = pnand %p433_p1, %p430_p0 }
   0x8   :  { %438 = shalt.err (!%p435_p2)
}
   0x9   :  { %s439_s27 = scalar_lea.vmem %s29_s19, 2048  ;;  %p444_p4 = scmp.lt.s32.totalorder %s29_s19, %s29_s19 }
   0xa   :  { %p440_p3 = scmp.ne.s32.totalorder %s29_s19, %s439_s27  ;;  %p445_p5 = scmp.lt.s32.totalorder %s439_s27, %s439_s27 }
   0xc   :  { %p446_p6 = por %p445_p5, %p444_p4 }
   0xe   :  { %p447_p7 = pnand %p446_p6, %p440_p3 }
  0x10   :  { %450 = shalt.err (!%p447_p7)
}
  0x11   :  { %s524_s28 = smov 128   ;;  %s525_s29 = smov 8  }
  0x12   :  { %34 = dma.hbm_to_vmem [thread:$0]  %s639_s1, 2048, %s29_s19, [#allocation6], %s524_s28, %s524_s28, %s525_s29  }
  0x13   :  { %s526_s7 = smov [#allocation2]   ;;  %s527_s9 = smov [#allocation7]  }
  0x14   :  { %s19_s8 = sshll.u32 %s526_s7, 4  ;;  %s42_s10 = sshll.u32 %s527_s9, 4  ;;  %s20_s8 = int_to_ptr.vmem [resolvable:$true] %s19_s8  ;;  %s43_s10 = int_to_ptr.vmem [resolvable:$true] %s42_s10 }
  0x15   :  { %s451_s13 = scalar_lea.hbm %s638_s0, 128 }
  0x16   :  { %p452_p8 = scmp.ne.s32.totalorder %s638_s0, %s451_s13  ;;  %p455_p9 = scmp.lt.u32.totalorder %s451_s13, %s638_s0 }
  0x18   :  { %p457_p10 = pnand %p455_p9, %p452_p8 }
  0x1a   :  { %460 = shalt.err (!%p457_p10)
}
  0x1b   :  { %s461_s1 = scalar_lea.vmem %s20_s8, 128  ;;  %p466_p12 = scmp.lt.s32.totalorder %s20_s8, %s20_s8 }
  0x1c   :  { %p462_p11 = scmp.ne.s32.totalorder %s20_s8, %s461_s1  ;;  %p467_p13 = scmp.lt.s32.totalorder %s461_s1, %s461_s1 }
  0x1e   :  { %p468_p0 = por %p467_p13, %p466_p12 }
  0x20   :  { %p469_p1 = pnand %p468_p0, %p462_p11 }
  0x22   :  { %472 = shalt.err (!%p469_p1)
}
  0x23   :  { %22 = dma.hbm_to_vmem [thread:$0]  %s638_s0, 128, %s20_s8, [#allocation3]  }
  0x24   :  { %s473_s22 = scalar_lea.hbm %s641_s3, 2048 }
  0x25   :  { %p474_p2 = scmp.ne.s32.totalorder %s641_s3, %s473_s22  ;;  %p477_p3 = scmp.lt.u32.totalorder %s473_s22, %s641_s3 }
  0x27   :  { %p479_p4 = pnand %p477_p3, %p474_p2 }
  0x29   :  { %482 = shalt.err (!%p479_p4)
}
  0x2a   :  { %s483_s27 = scalar_lea.vmem %s43_s10, 2048  ;;  %p488_p6 = scmp.lt.s32.totalorder %s43_s10, %s43_s10 }
  0x2b   :  { %p484_p5 = scmp.ne.s32.totalorder %s43_s10, %s483_s27  ;;  %p489_p7 = scmp.lt.s32.totalorder %s483_s27, %s483_s27 }
  0x2d   :  { %p490_p8 = por %p489_p7, %p488_p6 }
  0x2f   :  { %p491_p9 = pnand %p490_p8, %p484_p5 }
  0x31   :  { %494 = shalt.err (!%p491_p9)
}
  0x32   :  { %48 = dma.hbm_to_vmem [thread:$0]  %s641_s3, 2048, %s43_s10, [#allocation6], %s524_s28, %s524_s28, %s525_s29  }
  0x33   :  { %517 = dma.done.wait [#allocation3], 128  }
  0x34   :  { %518 = vsyncadd [#allocation3], 4294967168 }
  0x35   :  { %519 = dma.done.wait [#allocation6], 4096  }
  0x36   :  { %520 = vsyncadd [#allocation6], 4294963200  ;;  %v528_v0 = vmov 0.0|0.0   ;;  %vm529_vm0 = vmmov 0   ;;  %v530_v1 = vmov 0.0   ;;  %v61_v2 = vld [vmem:[#allocation5] sm:$0xff] }
  0x37   :  { %372 = vmatprep.subr.bf16.mxu0 %v528_v0  ;;  %334 = vmatprep.mubr.msk.f32.mxu0 %vm529_vm0, %v530_v1  ;;  %v62_v3 = vld [vmem:[#allocation5 + $0x8] sm:$0xff]  ;;  %v63_v5 = vld [vmem:[#allocation5 + $0x10] sm:$0xff]  ;;  %v64_v6 = vld [vmem:[#allocation5 + $0x18] sm:$0xff]  ;;  %s531_s7 = smov [#allocation8]  }
  0x38   :  { %396 = vmatprep.subr.bf16.mxu1 %v528_v0  ;;  %369 = vmatprep.mubr.msk.f32.mxu1 %vm529_vm0, %v530_v1  ;;  %v373_v4 = vpack.c.bf16 %v62_v3, %v61_v2  ;;  %v155_v7 = vld [vmem:[#allocation7] sm:$0xff]  ;;  %v156_v8 = vld [vmem:[#allocation7 + $0x8] sm:$0xff]  ;;  %v376_v9 = vpack.c.bf16 %v64_v6, %v63_v5  ;;  %v157_v11 = vld [vmem:[#allocation7 + $0x10] sm:$0xff]  ;;  %s256_s8 = sshll.u32 %s531_s7, 4  ;;  %s257_s8 = int_to_ptr.vmem [resolvable:$true] %s256_s8 }
  0x39   :  { %v397_v10 = vpack.c.bf16 %v156_v8, %v155_v7  ;;  %v158_v12 = vld [vmem:[#allocation7 + $0x18] sm:$0xff]  ;;  %v65_v13 = vld [vmem:[#allocation5 + $0x20] sm:$0xff]  ;;  %v66_v14 = vld [vmem:[#allocation5 + $0x28] sm:$0xff]  ;;  %s495_s9 = scalar_lea.vmem %s257_s8, 128  ;;  %p500_p11 = scmp.lt.s32.totalorder %s257_s8, %s257_s8 }
  0x3a   :  { %374 = vmatpush3.bf16.xpose.msra.mxu0 %v373_v4  ;;  %v400_v15 = vpack.c.bf16 %v158_v12, %v157_v11  ;;  %v379_v16 = vpack.c.bf16 %v66_v14, %v65_v13  ;;  %v159_v17 = vld [vmem:[#allocation7 + $0x20] sm:$0xff]  ;;  %v160_v18 = vld [vmem:[#allocation7 + $0x28] sm:$0xff]  ;;  %v67_v19 = vld [vmem:[#allocation5 + $0x30] sm:$0xff]  ;;  %p496_p10 = scmp.ne.s32.totalorder %s257_s8, %s495_s9  ;;  %p501_p12 = scmp.lt.s32.totalorder %s495_s9, %s495_s9 }
  0x3b   :  { %375 = vmatprep.subr.bf16.mxu0 %v528_v0  ;;  %398 = vmatpush3.bf16.xpose.msra.mxu1 %v397_v10  ;;  %v68_v20 = vld [vmem:[#allocation5 + $0x38] sm:$0xff]  ;;  %v403_v21 = vpack.c.bf16 %v160_v18, %v159_v17  ;;  %v161_v23 = vld [vmem:[#allocation7 + $0x30] sm:$0xff]  ;;  %v69_v25 = vld [vmem:[#allocation5 + $0x40] sm:$0xff] }
  0x3c   :  { %399 = vmatprep.subr.bf16.mxu1 %v528_v0  ;;  %v382_v22 = vpack.c.bf16 %v68_v20, %v67_v19  ;;  %v162_v24 = vld [vmem:[#allocation7 + $0x38] sm:$0xff]  ;;  %v70_v26 = vld [vmem:[#allocation5 + $0x48] sm:$0xff]  ;;  %v163_v29 = vld [vmem:[#allocation7 + $0x40] sm:$0xff]  ;;  %p502_p13 = por %p501_p12, %p500_p11 }
  0x3d   :  { %v406_v27 = vpack.c.bf16 %v162_v24, %v161_v23  ;;  %v385_v28 = vpack.c.bf16 %v70_v26, %v69_v25  ;;  %v164_v30 = vld [vmem:[#allocation7 + $0x48] sm:$0xff]  ;;  %v71_v31 = vld [vmem:[#allocation5 + $0x50] sm:$0xff]  ;;  %v72_v32 = vld [vmem:[#allocation5 + $0x58] sm:$0xff] }
  0x3e   :  { %v409_v33 = vpack.c.bf16 %v164_v30, %v163_v29  ;;  %v388_v34 = vpack.c.bf16 %v72_v32, %v71_v31  ;;  %v165_v35 = vld [vmem:[#allocation7 + $0x50] sm:$0xff]  ;;  %v166_v36 = vld [vmem:[#allocation7 + $0x58] sm:$0xff]  ;;  %v73_v37 = vld [vmem:[#allocation5 + $0x60] sm:$0xff]  ;;  %p503_p0 = pnand %p502_p13, %p496_p10 }
  0x3f   :  { %v74_v38 = vld [vmem:[#allocation5 + $0x68] sm:$0xff]  ;;  %v412_v39 = vpack.c.bf16 %v166_v36, %v165_v35  ;;  %v167_v41 = vld [vmem:[#allocation7 + $0x60] sm:$0xff]  ;;  %v75_v43 = vld [vmem:[#allocation5 + $0x70] sm:$0xff] }
  0x40   :  { %v391_v40 = vpack.c.bf16 %v74_v38, %v73_v37  ;;  %v168_v42 = vld [vmem:[#allocation7 + $0x68] sm:$0xff]  ;;  %v76_v44 = vld [vmem:[#allocation5 + $0x78] sm:$0xff]  ;;  %v169_v47 = vld [vmem:[#allocation7 + $0x70] sm:$0xff] }
  0x41   :  { %v415_v45 = vpack.c.bf16 %v168_v42, %v167_v41  ;;  %v394_v46 = vpack.c.bf16 %v76_v44, %v75_v43  ;;  %v170_v48 = vld [vmem:[#allocation7 + $0x78] sm:$0xff] }
  0x42   :  { %377 = vmatpush3.bf16.xpose.msra.mxu0 %v376_v9  ;;  %v418_v49 = vpack.c.bf16 %v170_v48, %v169_v47  ;;  %v60_v50 = vld [vmem:[#allocation2] sm:$0xff] }
  0x43   :  { %378 = vmatprep.subr.bf16.mxu0 %v528_v0  ;;  %401 = vmatpush3.bf16.xpose.msra.mxu1 %v400_v15  ;;  %v266_v51 = vld [vmem:[%s640_s2] ss:$0 sm:$0xff] }
  0x44   :  { %402 = vmatprep.subr.bf16.mxu1 %v528_v0  ;;  %v267_v56 = vld [vmem:[%s642_s4] ss:$0 sm:$0xff] }
  0x4a   :  { %380 = vmatpush3.bf16.xpose.msra.mxu0 %v379_v16 }
  0x4b   :  { %381 = vmatprep.subr.bf16.mxu0 %v528_v0  ;;  %404 = vmatpush3.bf16.xpose.msra.mxu1 %v403_v21 }
  0x4c   :  { %405 = vmatprep.subr.bf16.mxu1 %v528_v0 }
  0x52   :  { %383 = vmatpush3.bf16.xpose.msra.mxu0 %v382_v22 }
  0x53   :  { %384 = vmatprep.subr.bf16.mxu0 %v528_v0  ;;  %407 = vmatpush3.bf16.xpose.msra.mxu1 %v406_v27 }
  0x54   :  { %408 = vmatprep.subr.bf16.mxu1 %v528_v0 }
  0x5a   :  { %386 = vmatpush3.bf16.xpose.msra.mxu0 %v385_v28 }
  0x5b   :  { %387 = vmatprep.subr.bf16.mxu0 %v528_v0  ;;  %410 = vmatpush3.bf16.xpose.msra.mxu1 %v409_v33 }
  0x5c   :  { %411 = vmatprep.subr.bf16.mxu1 %v528_v0 }
  0x62   :  { %389 = vmatpush3.bf16.xpose.msra.mxu0 %v388_v34 }
  0x63   :  { %390 = vmatprep.subr.bf16.mxu0 %v528_v0  ;;  %413 = vmatpush3.bf16.xpose.msra.mxu1 %v412_v39 }
  0x64   :  { %414 = vmatprep.subr.bf16.mxu1 %v528_v0 }
  0x6a   :  { %392 = vmatpush3.bf16.xpose.msra.mxu0 %v391_v40 }
  0x6b   :  { %393 = vmatprep.subr.bf16.mxu0 %v528_v0  ;;  %416 = vmatpush3.bf16.xpose.msra.mxu1 %v415_v45 }
  0x6c   :  { %417 = vmatprep.subr.bf16.mxu1 %v528_v0 }
  0x72   :  { %395 = vmatpush3.bf16.xpose.msra.mxu0 %v394_v46 }
  0x73   :  { %419 = vmatpush3.bf16.xpose.msra.mxu1 %v418_v49 }
  0x79   :  { %335 = vmatmul.mubr.f32.vlgmr.msra.gmra.mrb[0].mxu0 %v60_v50 }
 0x14c   :  { %v150_v52 = vpop.f32.mrb[0].mxu0 }
 0x14d   :  { %v151_v53 = vadd.f32 %v266_v51, %v150_v52  ;;  %v336_v54 = vpop.f32.mrb[1].mxu0 }
 0x14f   :  { %v154_v55 = vmax.f32 %v151_v53, 0.0 }
 0x151   :  { %370 = vmatmul.mubr.f32.vlgmr.msra.gmra.mrb[0].mxu1 %v154_v55 }
 0x224   :  { %v244_v57 = vpop.f32.mrb[0].mxu1 }
 0x225   :  { %v245_v58 = vadd.f32 %v267_v56, %v244_v57  ;;  %v371_v59 = vpop.f32.mrb[1].mxu1 }
 0x227   :  { %v248_v60 = vadd.f32 %v245_v58, %v60_v50 }
 0x229   :  { %249 = vst [vmem:[#allocation8] sm:$0xff] %v248_v60 }
 0x22a   :  { %506 = shalt.err (!%p503_p0)
}
 0x22b   :  { %s507_s11 = scalar_lea.hbm %s643_s5, 128 }
 0x22c   :  { %p508_p1 = scmp.ne.s32.totalorder %s643_s5, %s507_s11  ;;  %p511_p2 = scmp.lt.u32.totalorder %s507_s11, %s643_s5 }
 0x22e   :  { %p513_p3 = pnand %p511_p2, %p508_p1 }
 0x230   :  { %516 = shalt.err (!%p513_p3)
}
 0x231   :  { %259 = dma.vmem_to_hbm [thread:$0]  %s257_s8, 128, %s643_s5, [#allocation4]  }
 0x232   :  { %521 = dma.done.wait [#allocation4], 128  }
 0x233   :  { %522 = vsyncadd [#allocation4], 4294967168 }
 0x234   :  { %263 = vsyncpa [#allocation3], 1 }
 0x235   :  { %264 = vsyncpa [#allocation6], 1 }
 0x236   :  { %265 = vsyncpa [#allocation4], 1 }

</bundles_post_ra>
